<compile_context>
chip_gen: v7x
topology: tpu7x:2x2x1
jax: 0.10.0
libtpu: 0.0.40
codegen_flags: <defaults>
</compile_context>

<pallas_src>
import functools

import jax
import jax.numpy as jnp
from jax import lax
from jax.experimental import pallas as pl
from jax.experimental.pallas import tpu as pltpu


def _ortho_loss_kernel(e_ref, s_ref, o_ref, *, true_b: int, tb: int):
    # Load one (TB, D) row-tile of each input, compute in f32.
    e = e_ref[...].astype(jnp.float32)
    s = s_ref[...].astype(jnp.float32)

    # Per-row dot product and squared L2 norms (lane-axis reductions).
    dot = jnp.sum(e * s, axis=1, keepdims=True)        # (TB, 1)
    sum_e2 = jnp.sum(e * e, axis=1, keepdims=True)     # (TB, 1)
    sum_s2 = jnp.sum(s * s, axis=1, keepdims=True)     # (TB, 1)

    # Exact sqrt + exact EUP reciprocal keeps the PyTorch eps semantics
    # (eps added to the *product of norms*) and the 1e-5 tolerance.
    denom = jnp.sqrt(sum_e2) * jnp.sqrt(sum_s2) + 1e-8
    cos = dot * pl.reciprocal(denom, approx=False)
    cos2 = cos * cos

    # Mask padded rows of a ragged last block.
    row = lax.broadcasted_iota(jnp.int32, (tb, 1), 0) + pl.program_id(0) * tb
    cos2 = jnp.where(row < true_b, cos2, 0.0)

    # Per-block partial sum, replicated across the (8, 128) output tile so the
    # store is lane-dense (unmasked vst).
    psum = jnp.sum(cos2)
    o_ref[...] = jnp.full(o_ref.shape, psum, dtype=o_ref.dtype)


def orthogonality_loss(emotion_features, subject_features):
    assert emotion_features.shape == subject_features.shape
    B, D = emotion_features.shape
    itemsize = jnp.dtype(emotion_features.dtype).itemsize

    # --- choose the row-tile size TB -------------------------------------
    # Budget: 2 inputs x 2 pipeline buffers x TB x D x itemsize  <= ~12 MiB,
    # which fits comfortably inside the 32 MiB scoped-VMEM limit on every
    # generation (v7x included), while being large enough (>=512 rows when D
    # permits) to amortize the ~0.35 us per-grid-step overhead.
    target_in_bytes = 12 * 1024 * 1024
    per_row_bytes = 2 * 2 * D * itemsize
    tb = target_in_bytes // max(per_row_bytes, 1)
    tb = max(8, min(1024, (tb // 8) * 8))          # multiple of 8 sublanes
    tb = min(tb, max(8, ((B + 7) // 8) * 8))        # don't exceed (padded) B

    num_blocks = pl.cdiv(B, tb)

    kernel = functools.partial(_ortho_loss_kernel, true_b=B, tb=tb)

    partial_sums = pl.pallas_call(
        kernel,
        out_shape=jax.ShapeDtypeStruct((num_blocks, 8, 128), jnp.float32),
        grid=(num_blocks,),
        in_specs=[
            pl.BlockSpec((tb, D), lambda i: (i, 0)),
            pl.BlockSpec((tb, D), lambda i: (i, 0)),
        ],
        out_specs=pl.BlockSpec((1, 8, 128), lambda i: (i, 0, 0)),
        compiler_params=pltpu.CompilerParams(
            dimension_semantics=("parallel",),
            vmem_limit_bytes=32 * 1024 * 1024,
        ),
    )(emotion_features, subject_features)

    # Tiny final reduction + mean over the true batch size in the wrapper.
    return jnp.sum(partial_sums[:, 0, 0]) / B


def _reference(e, s):
    e = e.astype(jnp.float32)
    s = s.astype(jnp.float32)
    dot = jnp.sum(e * s, axis=1)
    ne = jnp.linalg.norm(e, axis=1)
    ns = jnp.linalg.norm(s, axis=1)
    cos = dot / (ne * ns + 1e-8)
    return jnp.mean(cos ** 2)


if __name__ == "__main__":
    key = jax.random.PRNGKey(0)
    k1, k2 = jax.random.split(key)
    B, D = 8, 32
    emotion_features = jax.random.normal(k1, (B, D), dtype=jnp.float32)
    subject_features = jax.random.normal(k2, (B, D), dtype=jnp.float32)

    loss = orthogonality_loss(emotion_features, subject_features)
    loss = jax.block_until_ready(loss)

    ref = _reference(emotion_features, subject_features)
    assert jnp.allclose(loss, ref, atol=1e-5, rtol=1e-5), (loss, ref)

    print("KERNEL_OK")
</pallas_src>

<mosaic_0001>
module attributes {stable_mosaic.version = 11 : i64} {
  func.func @_ortho_loss_kernel(%arg0: i32, %arg1: memref<8x32xf32, #tpu.memory_space<vmem>>, %arg2: memref<8x32xf32, #tpu.memory_space<vmem>>, %arg3: memref<1x8x128xf32, #tpu.memory_space<vmem>>) attributes {dimension_semantics = [#tpu.dimension_semantics<parallel>], iteration_bounds = array<i64: 1>, scalar_prefetch = 0 : i64, scratch_operands = 0 : i64, tpu.core_type = #tpu.core_type<tc>, window_params = [{transform_indices = @transform_0, window_bounds = array<i64: 8, 32>}, {transform_indices = @transform_1, window_bounds = array<i64: 8, 32>}, {transform_indices = @transform_2, window_bounds = array<i64: 1, 8, 128>}]} {
    %c0 = arith.constant 0 : index
    %c0_0 = arith.constant 0 : index
    %0 = vector.load %arg1[%c0, %c0_0] : memref<8x32xf32, #tpu.memory_space<vmem>>, vector<8x32xf32>
    %c0_1 = arith.constant 0 : index
    %c0_2 = arith.constant 0 : index
    %1 = vector.load %arg2[%c0_1, %c0_2] : memref<8x32xf32, #tpu.memory_space<vmem>>, vector<8x32xf32>
    %2 = arith.mulf %0, %1 : vector<8x32xf32>
    %cst = arith.constant dense<0.000000e+00> : vector<8xf32>
    %3 = vector.multi_reduction <add>, %2, %cst [1] : vector<8x32xf32> to vector<8xf32>
    %4 = vector.shape_cast %3 : vector<8xf32> to vector<8x1xf32>
    %5 = arith.mulf %0, %0 : vector<8x32xf32>
    %cst_3 = arith.constant dense<0.000000e+00> : vector<8xf32>
    %6 = vector.multi_reduction <add>, %5, %cst_3 [1] : vector<8x32xf32> to vector<8xf32>
    %7 = vector.shape_cast %6 : vector<8xf32> to vector<8x1xf32>
    %8 = arith.mulf %1, %1 : vector<8x32xf32>
    %cst_4 = arith.constant dense<0.000000e+00> : vector<8xf32>
    %9 = vector.multi_reduction <add>, %8, %cst_4 [1] : vector<8x32xf32> to vector<8xf32>
    %10 = vector.shape_cast %9 : vector<8xf32> to vector<8x1xf32>
    %11 = math.sqrt %7 : vector<8x1xf32>
    %12 = math.sqrt %10 : vector<8x1xf32>
    %13 = arith.mulf %11, %12 : vector<8x1xf32>
    %cst_5 = arith.constant 9.99999993E-9 : f32
    %14 = vector.broadcast %cst_5 : f32 to vector<8x1xf32>
    %15 = arith.addf %13, %14 : vector<8x1xf32>
    %16 = tpu.reciprocal %15 : vector<8x1xf32> -> vector<8x1xf32>
    %17 = arith.mulf %4, %16 : vector<8x1xf32>
    %18 = arith.mulf %17, %17 : vector<8x1xf32>
    %19 = tpu.iota {dimensions = array<i32: 0>} : vector<8x1xi32>
    %c8_i32 = arith.constant 8 : i32
    %20 = arith.muli %arg0, %c8_i32 : i32
    %21 = vector.broadcast %20 : i32 to vector<8x1xi32>
    %22 = arith.addi %19, %21 : vector<8x1xi32>
    %c8_i32_6 = arith.constant 8 : i32
    %23 = vector.broadcast %c8_i32_6 : i32 to vector<8x1xi32>
    %24 = arith.cmpi slt, %22, %23 : vector<8x1xi32>
    %cst_7 = arith.constant 0.000000e+00 : f32
    %25 = vector.broadcast %cst_7 : f32 to vector<8x1xf32>
    %26 = arith.select %24, %18, %25 : vector<8x1xi1>, vector<8x1xf32>
    %27 = vector.shape_cast %26 : vector<8x1xf32> to vector<1x8x1xf32>
    %cst_8 = arith.constant dense<0.000000e+00> : vector<1xf32>
    %28 = vector.multi_reduction <add>, %27, %cst_8 [1, 2] : vector<1x8x1xf32> to vector<1xf32>
    %29 = vector.shape_cast %28 : vector<1xf32> to vector<1x1x1xf32>
    %30 = vector.extract %29[0, 0, 0] : f32 from vector<1x1x1xf32>
    %31 = vector.broadcast %30 : f32 to vector<1x8x128xf32>
    %c0_9 = arith.constant 0 : index
    %c0_10 = arith.constant 0 : index
    %c0_11 = arith.constant 0 : index
    %32 = vector.load %arg3[%c0_9, %c0_10, %c0_11] : memref<1x8x128xf32, #tpu.memory_space<vmem>>, vector<1x8x128xf32>
    tpu.vector_store %arg3[%c0_9, %c0_10, %c0_11], %31 {strides = array<i32>} : memref<1x8x128xf32, #tpu.memory_space<vmem>>, vector<1x8x128xf32>,
    return
  }
  func.func @transform_0(%arg0: i32) -> (i32, i32) {
    %c0_i32 = arith.constant 0 : i32
    %c0_i32_0 = arith.constant 0 : i32
    return %arg0, %c0_i32 : i32, i32
  }
  func.func @transform_1(%arg0: i32) -> (i32, i32) {
    %c0_i32 = arith.constant 0 : i32
    %c0_i32_0 = arith.constant 0 : i32
    return %arg0, %c0_i32 : i32, i32
  }
  func.func @transform_2(%arg0: i32) -> (i32, i32, i32) {
    %c0_i32 = arith.constant 0 : i32
    %c0_i32_0 = arith.constant 0 : i32
    %c0_i32_1 = arith.constant 0 : i32
    return %arg0, %c0_i32, %c0_i32_0 : i32, i32, i32
  }
}

</mosaic_0001>

<bundles_post_ra>
// kernel: tpu_custom_call.1
= control target key start
LH: loop header
LB: loop body
LE: loop exit
PB: predicated region body
PF: predicated region fallthrough
CT: control target
= control target key end

     0   :  { %7 = vsyncpa [#allocation3], 0  ;;  %s243_s0 = inlined_call_operand.hbm [shape: f32[8,32], index: 0, kind: input, shape index: {}]   ;;  %s244_s1 = inlined_call_operand.hbm [shape: f32[8,32], index: 1, kind: input, shape index: {}]   ;;  %s245_s2 = inlined_call_operand.hbm [shape: f32[1,8,128], index: 2, kind: output, shape index: {}]  }
   0x1   :  { %8 = vsyncpa [#allocation6], 0 }
   0x2   :  { %9 = vsyncpa [#allocation4], 0  ;;  %s189_s9 = smov [#allocation2]   ;;  %s190_s11 = smov [#allocation5]  }
   0x3   :  { %s16_s10 = sshll.u32 %s189_s9, 4  ;;  %s26_s12 = sshll.u32 %s190_s11, 4  ;;  %s17_s10 = int_to_ptr.vmem [resolvable:$true] %s16_s10  ;;  %s27_s12 = int_to_ptr.vmem [resolvable:$true] %s26_s12 }
   0x4   :  { %s117_s15 = scalar_lea.hbm %s243_s0, 128 }
   0x5   :  { %p118_p0 = scmp.ne.s32.totalorder %s243_s0, %s117_s15  ;;  %p121_p1 = scmp.lt.u32.totalorder %s117_s15, %s243_s0 }
   0x7   :  { %p123_p2 = pnand %p121_p1, %p118_p0 }
   0x9   :  { %126 = shalt.err (!%p123_p2)
}
   0xa   :  { %s127_s20 = scalar_lea.vmem %s17_s10, 128  ;;  %p132_p4 = scmp.lt.s32.totalorder %s17_s10, %s17_s10 }
   0xb   :  { %p128_p3 = scmp.ne.s32.totalorder %s17_s10, %s127_s20  ;;  %p133_p5 = scmp.lt.s32.totalorder %s127_s20, %s127_s20 }
   0xd   :  { %p134_p6 = por %p133_p5, %p132_p4 }
   0xf   :  { %p135_p7 = pnand %p134_p6, %p128_p3 }
  0x11   :  { %138 = shalt.err (!%p135_p7)
}
  0x12   :  { %19 = dma.hbm_to_vmem [thread:$0]  %s243_s0, 128, %s17_s10, [#allocation3]  }
  0x13   :  { %s139_s25 = scalar_lea.hbm %s244_s1, 128 }
  0x14   :  { %p140_p8 = scmp.ne.s32.totalorder %s244_s1, %s139_s25  ;;  %p143_p9 = scmp.lt.u32.totalorder %s139_s25, %s244_s1 }
  0x16   :  { %p145_p10 = pnand %p143_p9, %p140_p8 }
  0x18   :  { %148 = shalt.err (!%p145_p10)
}
  0x19   :  { %s149_s30 = scalar_lea.vmem %s27_s12, 128  ;;  %p154_p12 = scmp.lt.s32.totalorder %s27_s12, %s27_s12 }
  0x1a   :  { %p150_p11 = scmp.ne.s32.totalorder %s27_s12, %s149_s30  ;;  %p155_p13 = scmp.lt.s32.totalorder %s149_s30, %s149_s30 }
  0x1c   :  { %p156_p0 = por %p155_p13, %p154_p12 }
  0x1e   :  { %p157_p1 = pnand %p156_p0, %p150_p11 }
  0x20   :  { %160 = shalt.err (!%p157_p1)
}
  0x21   :  { %29 = dma.hbm_to_vmem [thread:$0]  %s244_s1, 128, %s27_s12, [#allocation6]  }
  0x22   :  { %183 = dma.done.wait [#allocation3], 128  }
  0x23   :  { %184 = vsyncadd [#allocation3], 4294967168 }
  0x24   :  { %185 = dma.done.wait [#allocation6], 128  }
  0x25   :  { %186 = vsyncadd [#allocation6], 4294967168  ;;  %v36_v0 = vld [vmem:[#allocation2] sm:$0xff]  ;;  %vm39_vm0 = vcmask 261120   ;;  %v37_v1 = vld [vmem:[#allocation5] sm:$0xff]  ;;  %vm77_vm5 = vcmask 7168  }
  0x26   :  { %v43_v2 = vmul.f32 %v36_v0, %v36_v0  ;;  %v47_v3 = vmul.f32 %v37_v1, %v37_v1  ;;  %v38_v4 = vmul.f32 %v37_v1, %v36_v0  ;;  %s191_s1 = smov [#allocation7]  }
  0x27   :  { %s96_s4 = sshll.u32 %s191_s1, 4  ;;  %s97_s4 = int_to_ptr.vmem [resolvable:$true] %s96_s4 }
  0x28   :  { %v44_v5 = vsel %vm39_vm0, %v43_v2, 0.0  ;;  %v40_v6 = vsel %vm39_vm0, %v38_v4, 0.0  ;;  %v48_v7 = vsel %vm39_vm0, %v47_v3, 0.0  ;;  %s161_s6 = scalar_lea.vmem %s97_s4, 128  ;;  %p166_p3 = scmp.lt.s32.totalorder %s97_s4, %s97_s4 }
  0x29   :  { %45 = vadd.xlane.f32.xlu0 %v44_v5  ;;  %41 = vadd.xlane.f32.xlu1 %v40_v6  ;;  %p162_p2 = scmp.ne.s32.totalorder %s97_s4, %s161_s6  ;;  %p167_p4 = scmp.lt.s32.totalorder %s161_s6, %s161_s6 }
  0x2b   :  { %p168_p5 = por %p167_p4, %p166_p3 }
  0x2d   :  { %49 = vadd.xlane.f32.xlu0 %v48_v7  ;;  %p169_p6 = pnand %p168_p5, %p162_p2 }
  0xb6   :  { %v46_v8 = vpop.xlane.xlu0 %45  ;;  %v42_v22 = vpop.xlane.xlu1 %41 }
  0xb7   :  { %111 = vrsqrt.f32 %v46_v8  ;;  %vm53_vm1 = vcmp.eq.f32.partialorder %v46_v8, inf  ;;  %v56_v15 = vand.u32 2147483648, %v46_v8  ;;  %vm55_vm3 = vcmp.eq.f32.partialorder %v46_v8, 0.0 }
  0xba   :  { %v50_v9 = vpop.xlane.xlu0 %49 }
  0xbb   :  { %113 = vrsqrt.f32 %v50_v9  ;;  %vm60_vm2 = vcmp.eq.f32.partialorder %v50_v9, inf  ;;  %v63_v16 = vand.u32 2147483648, %v50_v9  ;;  %vm62_vm4 = vcmp.eq.f32.partialorder %v50_v9, 0.0 }
  0xc1   :  { %v112_v10 = vpop.eup %111 }
  0xc2   :  { %v52_v11 = vmul.f32 %v112_v10, %v46_v8 }
  0xc4   :  { %v54_v13 = vsel %vm53_vm1, %v46_v8, %v52_v11 }
  0xc5   :  { %v114_v12 = vpop.eup %113  ;;  %v57_v18 = vsel %vm55_vm3, %v56_v15, %v54_v13 }
  0xc6   :  { %v59_v14 = vmul.f32 %v114_v12, %v50_v9 }
  0xc8   :  { %v61_v17 = vsel %vm60_vm2, %v50_v9, %v59_v14 }
  0xc9   :  { %v64_v19 = vsel %vm62_vm4, %v63_v16, %v61_v17 }
  0xca   :  { %v65_v20 = vmul.f32 %v64_v19, %v57_v18 }
  0xcc   :  { %v66_v21 = vadd.f32 1e-08, %v65_v20 }
  0xce   :  { %115 = vrcp.f32 %v66_v21 }
  0xd8   :  { %v116_v23 = vpop.eup %115 }
  0xd9   :  { %v68_v24 = vmul.f32 %v116_v23, %v42_v22 }
  0xdb   :  { %v69_v25 = vmul.f32 %v68_v24, %v68_v24 }
  0xdd   :  { %v78_v26 = vsel %vm77_vm5, %v69_v25, 0.0 }
  0xde   :  { %79 = vadd.xlane.f32.xlu1 %v78_v26 }
 0x16b   :  { %v80_v27 = vpop.xlane.xlu1 %79 }
 0x16c   :  { %v81_v28 = vrot.slane %v80_v27, 4 }
 0x16e   :  { %v82_v29 = vadd.f32 %v81_v28, %v80_v27 }
 0x170   :  { %v83_v30 = vrot.slane %v82_v29, 2 }
 0x172   :  { %v84_v31 = vadd.f32 %v83_v30, %v82_v29 }
 0x174   :  { %v85_v32 = vrot.slane %v84_v31, 1 }
 0x176   :  { %v86_v33 = vadd.f32 %v85_v32, %v84_v31 }
 0x178   :  { %106 = vpush %v86_v33 }
 0x1a9   :  { %s107_s5 = spop %106 }
 0x1aa   :  { %v88_v34 = vstv %s107_s5 }
 0x1ab   :  { %89 = vst [vmem:[#allocation7] sm:$0xff] %v88_v34 }
 0x1ac   :  { %172 = shalt.err (!%p169_p6)
}
 0x1ad   :  { %s173_s9 = scalar_lea.hbm %s245_s2, 128 }
 0x1ae   :  { %p174_p7 = scmp.ne.s32.totalorder %s245_s2, %s173_s9  ;;  %p177_p8 = scmp.lt.u32.totalorder %s173_s9, %s245_s2 }
 0x1b0   :  { %p179_p9 = pnand %p177_p8, %p174_p7 }
 0x1b2   :  { %182 = shalt.err (!%p179_p9)
}
 0x1b3   :  { %99 = dma.vmem_to_hbm [thread:$0]  %s97_s4, 128, %s245_s2, [#allocation4]  }
 0x1b4   :  { %187 = dma.done.wait [#allocation4], 128  }
 0x1b5   :  { %188 = vsyncadd [#allocation4], 4294967168 }
 0x1b6   :  { %103 = vsyncpa [#allocation3], 1 }
 0x1b7   :  { %104 = vsyncpa [#allocation6], 1 }
 0x1b8   :  { %105 = vsyncpa [#allocation4], 1 }

</bundles_post_ra>
